<compile_context>
chip_gen: v7x
topology: tpu7x:2x2x1
jax: 0.10.0
libtpu: 0.0.40
codegen_flags: <defaults>
</compile_context>

<pallas_src>
import functools

import jax
import jax.numpy as jnp
from jax.experimental import pallas as pl
from jax.experimental.pallas import tpu as pltpu

LANE = 128
MXU_N = 256              # pad hidden to this multiple when hidden >= 256 (v6e/v7x MXU)
MAX_BATCH_TILE = 2048    # batch rows per grid step (amortizes ~0.35us/step overhead)
MIN_ROWS_TO_SPLIT = 512  # below this a single grid step wins, even on 2-TC v7x


def _round_up(x: int, m: int) -> int:
    return ((x + m - 1) // m) * m


def _cdiv(a: int, b: int) -> int:
    return -(-a // b)


def _pad2(a, rows: int, cols: int):
    r, c = a.shape
    return jnp.pad(a, ((0, rows - r), (0, cols - c)))


def _policy_mlp_kernel(x_ref, w1_ref, b1_ref, w2_ref, b2_ref, w3_ref, b3_ref,
                       o_ref):
    """One batch tile: tanh(relu(relu(x@W1+b1)@W2+b2)@W3+b3)."""
    x = x_ref[...]                                     # (tb, in_pad) matmul dtype

    # Matmuls on the MXU with f32 accumulation; elementwise stays f32 (VPU/EUP).
    # Each (1, N) bias is added exactly once per grid step, so the implicit
    # broadcast over the batch sublanes is materialized only once.
    h1 = jnp.dot(x, w1_ref[...], preferred_element_type=jnp.float32) + b1_ref[...]
    h1 = jnp.maximum(h1, 0.0)                          # ReLU

    h2 = jnp.dot(h1.astype(w2_ref.dtype), w2_ref[...],
                 preferred_element_type=jnp.float32) + b2_ref[...]
    h2 = jnp.maximum(h2, 0.0)                          # ReLU

    out = jnp.dot(h2.astype(w3_ref.dtype), w3_ref[...],
                  preferred_element_type=jnp.float32) + b3_ref[...]
    o_ref[...] = jnp.tanh(out).astype(o_ref.dtype)     # Tanh (EUP)


def prepare_policy_params(params, matmul_dtype=jnp.bfloat16):
    """Pad + cast the weights/biases ONCE; reuse the result across forwards.

    Weights are [in, out] (transposed vs. PyTorch), biases [1, out].  Padded
    rows/cols are zero, so ReLU(0)=0 / tanh(0)=0 keep the padding inert.
    """
    w1, b1 = params["w1"], params["b1"]
    w2, b2 = params["w2"], params["b2"]
    w3, b3 = params["w3"], params["b3"]
    in_size, hid = w1.shape
    n_act = w3.shape[1]

    in_pad = _round_up(in_size, LANE)
    hid_mult = MXU_N if hid >= MXU_N else LANE   # 256-wide N fills v6e/v7x MXU
    hid_pad = _round_up(hid, hid_mult)
    act_pad = _round_up(n_act, LANE)

    return {
        "w1": _pad2(w1, in_pad, hid_pad).astype(matmul_dtype),
        "b1": _pad2(b1, 1, hid_pad).astype(jnp.float32),
        "w2": _pad2(w2, hid_pad, hid_pad).astype(matmul_dtype),
        "b2": _pad2(b2, 1, hid_pad).astype(jnp.float32),
        "w3": _pad2(w3, hid_pad, act_pad).astype(matmul_dtype),
        "b3": _pad2(b3, 1, act_pad).astype(jnp.float32),
    }


def _pick_batch_tile(batch: int, sub: int) -> int:
    """Batch tile minimizing padding waste, with an (even, >=2) grid when the
    batch is big enough for v7x's two TensorCores to each take a tile."""
    n_tiles = max(1, _cdiv(batch, MAX_BATCH_TILE))
    if n_tiles == 1 and batch >= MIN_ROWS_TO_SPLIT:
        n_tiles = 2
    if n_tiles > 1 and n_tiles % 2:
        n_tiles += 1
    return _round_up(_cdiv(batch, n_tiles), sub)


@functools.partial(jax.jit, static_argnames=("num_actions",))
def deterministic_policy_forward(state, padded_params, num_actions):
    """state: [B, input_size] f32.  padded_params: output of prepare_policy_params."""
    w1_p, b1_p = padded_params["w1"], padded_params["b1"]
    w2_p, b2_p = padded_params["w2"], padded_params["b2"]
    w3_p, b3_p = padded_params["w3"], padded_params["b3"]

    matmul_dtype = w1_p.dtype
    is_bf16 = matmul_dtype == jnp.bfloat16
    B, _ = state.shape
    in_pad, hid_pad = w1_p.shape
    act_pad = w3_p.shape[1]

    # Sublane-friendly batch tile (bf16 packs 16 rows/vreg, f32 packs 8).
    sub = 16 if is_bf16 else 8
    tb = _pick_batch_tile(B, sub)
    b_pad = _round_up(B, tb)

    # Only the state is padded/cast per call (params are pre-padded/cached).
    x_p = _pad2(state, b_pad, in_pad).astype(matmul_dtype)

    # bf16 output halves the dominant HBM write stream; tanh output is in [-1,1].
    out_dtype = jnp.bfloat16 if is_bf16 else jnp.float32

    def resident(shape):
        # Constant-index blocks: single VMEM buffer (no pointless double-buffer).
        return pl.BlockSpec(shape, lambda i: (0, 0), pipeline_mode=pl.Buffered(1))

    out = pl.pallas_call(
        _policy_mlp_kernel,
        out_shape=jax.ShapeDtypeStruct((b_pad, act_pad), out_dtype),
        grid=(b_pad // tb,),
        in_specs=[
            pl.BlockSpec((tb, in_pad), lambda i: (i, 0)),   # state tile (pipelined)
            resident((in_pad, hid_pad)),                    # W1
            resident((1, hid_pad)),                         # b1
            resident((hid_pad, hid_pad)),                   # W2
            resident((1, hid_pad)),                         # b2
            resident((hid_pad, act_pad)),                   # W3
            resident((1, act_pad)),                         # b3
        ],
        out_specs=pl.BlockSpec((tb, act_pad), lambda i: (i, 0)),
        compiler_params=pltpu.CompilerParams(
            dimension_semantics=("parallel",)),             # v7x: shard over 2 TCs
    )(x_p, w1_p, b1_p, w2_p, b2_p, w3_p, b3_p)

    # Drop batch/action padding (padded lanes are tanh(0)=0); return f32.
    return out[:B, :num_actions].astype(jnp.float32)


def init_params(key, input_size, hidden_size, num_actions):
    """Mimics torch.nn.Linear's U(-1/sqrt(fan_in), 1/sqrt(fan_in)) init."""
    def linear(k, fan_in, fan_out):
        kw, kb = jax.random.split(k)
        bound = 1.0 / jnp.sqrt(jnp.float32(fan_in))
        w = jax.random.uniform(kw, (fan_in, fan_out), jnp.float32, -bound, bound)
        b = jax.random.uniform(kb, (1, fan_out), jnp.float32, -bound, bound)
        return w, b

    k1, k2, k3 = jax.random.split(key, 3)
    w1, b1 = linear(k1, input_size, hidden_size)
    w2, b2 = linear(k2, hidden_size, hidden_size)
    w3, b3 = linear(k3, hidden_size, num_actions)
    return {"w1": w1, "b1": b1, "w2": w2, "b2": b2, "w3": w3, "b3": b3}


def reference_forward(state, p):
    """Pure-JAX f32 reference (same semantics as the PyTorch module)."""
    h1 = jnp.maximum(state @ p["w1"] + p["b1"], 0.0)
    h2 = jnp.maximum(h1 @ p["w2"] + p["b2"], 0.0)
    return jnp.tanh(h2 @ p["w3"] + p["b3"])


if __name__ == "__main__":
    key = jax.random.PRNGKey(0)
    k_params, k_state, k_state2 = jax.random.split(key, 3)

    batch = 2
    input_size = 16
    hidden_size = 32
    num_actions = 4

    params = init_params(k_params, input_size, hidden_size, num_actions)
    padded_params = prepare_policy_params(params)   # pad/cast once, reuse

    # Small, module-consistent shapes (single-tile grid).
    state = jax.random.normal(k_state, (batch, input_size), jnp.float32)
    out = jax.block_until_ready(
        deterministic_policy_forward(state, padded_params,
                                     num_actions=num_actions))
    ref = reference_forward(state, params)
    assert out.shape == (batch, num_actions)
    # bf16 matmul inputs + bf16 output with f32 accumulation -> small rounding.
    assert jnp.allclose(out, ref, atol=2e-2, rtol=2e-2), "mismatch vs reference"

    # Larger batch to exercise the multi-tile (grid == 2, both v7x cores) path.
    big_b = 600
    state_big = jax.random.normal(k_state2, (big_b, input_size), jnp.float32)
    out_big = jax.block_until_ready(
        deterministic_policy_forward(state_big, padded_params,
                                     num_actions=num_actions))
    ref_big = reference_forward(state_big, params)
    assert out_big.shape == (big_b, num_actions)
    assert jnp.allclose(out_big, ref_big, atol=2e-2, rtol=2e-2), \
        "mismatch vs reference (gridded batch)"

    print("KERNEL_OK")
</pallas_src>

<mosaic_0001>
module attributes {stable_mosaic.version = 11 : i64} {
  func.func @_policy_mlp_kernel(%arg0: i32, %arg1: memref<16x128xbf16, #tpu.memory_space<vmem>>, %arg2: memref<128x128xbf16, #tpu.memory_space<vmem>>, %arg3: memref<1x128xf32, #tpu.memory_space<vmem>>, %arg4: memref<128x128xbf16, #tpu.memory_space<vmem>>, %arg5: memref<1x128xf32, #tpu.memory_space<vmem>>, %arg6: memref<128x128xbf16, #tpu.memory_space<vmem>>, %arg7: memref<1x128xf32, #tpu.memory_space<vmem>>, %arg8: memref<16x128xbf16, #tpu.memory_space<vmem>>) attributes {dimension_semantics = [#tpu.dimension_semantics<parallel>], iteration_bounds = array<i64: 1>, scalar_prefetch = 0 : i64, scratch_operands = 0 : i64, tpu.core_type = #tpu.core_type<tc>, window_params = [{transform_indices = @transform_0, window_bounds = array<i64: 16, 128>}, {pipeline_mode = #tpu.pipeline_mode<synchronous>, transform_indices = @transform_1, window_bounds = array<i64: 128, 128>}, {pipeline_mode = #tpu.pipeline_mode<synchronous>, transform_indices = @transform_2, window_bounds = array<i64: 1, 128>}, {pipeline_mode = #tpu.pipeline_mode<synchronous>, transform_indices = @transform_3, window_bounds = array<i64: 128, 128>}, {pipeline_mode = #tpu.pipeline_mode<synchronous>, transform_indices = @transform_4, window_bounds = array<i64: 1, 128>}, {pipeline_mode = #tpu.pipeline_mode<synchronous>, transform_indices = @transform_5, window_bounds = array<i64: 128, 128>}, {pipeline_mode = #tpu.pipeline_mode<synchronous>, transform_indices = @transform_6, window_bounds = array<i64: 1, 128>}, {transform_indices = @transform_7, window_bounds = array<i64: 16, 128>}]} {
    %c0 = arith.constant 0 : index
    %c0_0 = arith.constant 0 : index
    %0 = vector.load %arg1[%c0, %c0_0] : memref<16x128xbf16, #tpu.memory_space<vmem>>, vector<16x128xbf16>
    %c0_1 = arith.constant 0 : index
    %c0_2 = arith.constant 0 : index
    %1 = vector.load %arg2[%c0_1, %c0_2] : memref<128x128xbf16, #tpu.memory_space<vmem>>, vector<128x128xbf16>
    %cst = arith.constant dense<0.000000e+00> : vector<16x128xf32>
    %2 = tpu.matmul %0, %1, %cst {dimension_numbers = #tpu.dot_dimension_numbers<[1], [0], [0], [1], [0, 0, 1, 1], [], []>} : vector<16x128xbf16>, vector<128x128xbf16>, vector<16x128xf32> -> vector<16x128xf32>
    %c0_3 = arith.constant 0 : index
    %c0_4 = arith.constant 0 : index
    %3 = vector.load %arg3[%c0_3, %c0_4] : memref<1x128xf32, #tpu.memory_space<vmem>>, vector<1x128xf32>
    %4 = vector.broadcast %3 : vector<1x128xf32> to vector<16x128xf32>
    %5 = arith.addf %2, %4 : vector<16x128xf32>
    %cst_5 = arith.constant 0.000000e+00 : f32
    %6 = vector.broadcast %cst_5 : f32 to vector<16x128xf32>
    %7 = arith.maximumf %5, %6 : vector<16x128xf32>
    %8 = arith.truncf %7 : vector<16x128xf32> to vector<16x128xbf16>
    %c0_6 = arith.constant 0 : index
    %c0_7 = arith.constant 0 : index
    %9 = vector.load %arg4[%c0_6, %c0_7] : memref<128x128xbf16, #tpu.memory_space<vmem>>, vector<128x128xbf16>
    %cst_8 = arith.constant dense<0.000000e+00> : vector<16x128xf32>
    %10 = tpu.matmul %8, %9, %cst_8 {dimension_numbers = #tpu.dot_dimension_numbers<[1], [0], [0], [1], [0, 0, 1, 1], [], []>} : vector<16x128xbf16>, vector<128x128xbf16>, vector<16x128xf32> -> vector<16x128xf32>
    %c0_9 = arith.constant 0 : index
    %c0_10 = arith.constant 0 : index
    %11 = vector.load %arg5[%c0_9, %c0_10] : memref<1x128xf32, #tpu.memory_space<vmem>>, vector<1x128xf32>
    %12 = vector.broadcast %11 : vector<1x128xf32> to vector<16x128xf32>
    %13 = arith.addf %10, %12 : vector<16x128xf32>
    %cst_11 = arith.constant 0.000000e+00 : f32
    %14 = vector.broadcast %cst_11 : f32 to vector<16x128xf32>
    %15 = arith.maximumf %13, %14 : vector<16x128xf32>
    %16 = arith.truncf %15 : vector<16x128xf32> to vector<16x128xbf16>
    %c0_12 = arith.constant 0 : index
    %c0_13 = arith.constant 0 : index
    %17 = vector.load %arg6[%c0_12, %c0_13] : memref<128x128xbf16, #tpu.memory_space<vmem>>, vector<128x128xbf16>
    %cst_14 = arith.constant dense<0.000000e+00> : vector<16x128xf32>
    %18 = tpu.matmul %16, %17, %cst_14 {dimension_numbers = #tpu.dot_dimension_numbers<[1], [0], [0], [1], [0, 0, 1, 1], [], []>} : vector<16x128xbf16>, vector<128x128xbf16>, vector<16x128xf32> -> vector<16x128xf32>
    %c0_15 = arith.constant 0 : index
    %c0_16 = arith.constant 0 : index
    %19 = vector.load %arg7[%c0_15, %c0_16] : memref<1x128xf32, #tpu.memory_space<vmem>>, vector<1x128xf32>
    %20 = vector.broadcast %19 : vector<1x128xf32> to vector<16x128xf32>
    %21 = arith.addf %18, %20 : vector<16x128xf32>
    %22 = math.tanh %21 : vector<16x128xf32>
    %23 = arith.truncf %22 : vector<16x128xf32> to vector<16x128xbf16>
    %c0_17 = arith.constant 0 : index
    %c0_18 = arith.constant 0 : index
    %24 = vector.load %arg8[%c0_17, %c0_18] : memref<16x128xbf16, #tpu.memory_space<vmem>>, vector<16x128xbf16>
    tpu.vector_store %arg8[%c0_17, %c0_18], %23 {strides = array<i32>} : memref<16x128xbf16, #tpu.memory_space<vmem>>, vector<16x128xbf16>,
    return
  }
  func.func @transform_0(%arg0: i32) -> (i32, i32) {
    %c0_i32 = arith.constant 0 : i32
    %c0_i32_0 = arith.constant 0 : i32
    return %arg0, %c0_i32 : i32, i32
  }
  func.func @transform_1(%arg0: i32) -> (i32, i32) {
    %c0_i32 = arith.constant 0 : i32
    %c0_i32_0 = arith.constant 0 : i32
    %c0_i32_1 = arith.constant 0 : i32
    return %c0_i32, %c0_i32_0 : i32, i32
  }
  func.func @transform_2(%arg0: i32) -> (i32, i32) {
    %c0_i32 = arith.constant 0 : i32
    %c0_i32_0 = arith.constant 0 : i32
    %c0_i32_1 = arith.constant 0 : i32
    return %c0_i32, %c0_i32_0 : i32, i32
  }
  func.func @transform_3(%arg0: i32) -> (i32, i32) {
    %c0_i32 = arith.constant 0 : i32
    %c0_i32_0 = arith.constant 0 : i32
    %c0_i32_1 = arith.constant 0 : i32
    return %c0_i32, %c0_i32_0 : i32, i32
  }
  func.func @transform_4(%arg0: i32) -> (i32, i32) {
    %c0_i32 = arith.constant 0 : i32
    %c0_i32_0 = arith.constant 0 : i32
    %c0_i32_1 = arith.constant 0 : i32
    return %c0_i32, %c0_i32_0 : i32, i32
  }
  func.func @transform_5(%arg0: i32) -> (i32, i32) {
    %c0_i32 = arith.constant 0 : i32
    %c0_i32_0 = arith.constant 0 : i32
    %c0_i32_1 = arith.constant 0 : i32
    return %c0_i32, %c0_i32_0 : i32, i32
  }
  func.func @transform_6(%arg0: i32) -> (i32, i32) {
    %c0_i32 = arith.constant 0 : i32
    %c0_i32_0 = arith.constant 0 : i32
    %c0_i32_1 = arith.constant 0 : i32
    return %c0_i32, %c0_i32_0 : i32, i32
  }
  func.func @transform_7(%arg0: i32) -> (i32, i32) {
    %c0_i32 = arith.constant 0 : i32
    %c0_i32_0 = arith.constant 0 : i32
    return %arg0, %c0_i32 : i32, i32
  }
}

</mosaic_0001>

<bundles_post_ra>
// kernel: deterministic_policy_forward.1
= control target key start
LH: loop header
LB: loop body
LE: loop exit
PB: predicated region body
PF: predicated region fallthrough
CT: control target
= control target key end

     0   :  { %12 = vsyncpa [#allocation3], 0  ;;  %s810_s0 = inlined_call_operand.vmem [shape: bf16[16,128], index: 0, kind: input, shape index: {}]   ;;  %s811_s1 = inlined_call_operand.hbm [shape: bf16[128,128], index: 1, kind: input, shape index: {}]   ;;  %s812_s2 = inlined_call_operand.vmem [shape: f32[1,128], index: 2, kind: input, shape index: {}]   ;;  %s813_s3 = inlined_call_operand.hbm [shape: bf16[128,128], index: 3, kind: input, shape index: {}]   ;;  %s814_s4 = inlined_call_operand.vmem [shape: f32[1,128], index: 4, kind: input, shape index: {}]   ;;  %s815_s5 = inlined_call_operand.hbm [shape: bf16[128,128], index: 5, kind: input, shape index: {}]   ;;  %s816_s6 = inlined_call_operand.vmem [shape: f32[1,128], index: 6, kind: input, shape index: {}]   ;;  %s817_s7 = inlined_call_operand.vmem [shape: bf16[16,128], index: 7, kind: output, shape index: {}]  }
   0x1   :  { %13 = vsyncpa [#allocation5], 0  ;;  %s666_s24 = smov [#allocation4]   ;;  %s667_s26 = smov [#allocation2]  }
   0x2   :  { %s35_s25 = sshll.u32 %s666_s24, 4  ;;  %s21_s27 = sshll.u32 %s667_s26, 4  ;;  %s36_s25 = int_to_ptr.vmem [resolvable:$true] %s35_s25  ;;  %s713_s27 = int_to_ptr.vmem [resolvable:$true] %s21_s27 }
   0x3   :  { %s596_s30 = scalar_lea.hbm %s813_s3, 1024 }
   0x4   :  { %p597_p0 = scmp.ne.s32.totalorder %s813_s3, %s596_s30  ;;  %p600_p1 = scmp.lt.u32.totalorder %s596_s30, %s813_s3 }
   0x6   :  { %p602_p2 = pnand %p600_p1, %p597_p0 }
   0x8   :  { %605 = shalt.err (!%p602_p2)
}
   0x9   :  { %s606_s12 = scalar_lea.vmem %s36_s25, 1024  ;;  %p611_p4 = scmp.lt.s32.totalorder %s36_s25, %s36_s25 }
   0xa   :  { %p607_p3 = scmp.ne.s32.totalorder %s36_s25, %s606_s12  ;;  %p612_p5 = scmp.lt.s32.totalorder %s606_s12, %s606_s12 }
   0xc   :  { %p613_p6 = por %p612_p5, %p611_p4 }
   0xe   :  { %p614_p7 = pnand %p613_p6, %p607_p3 }
  0x10   :  { %617 = shalt.err (!%p614_p7)
}
  0x11   :  { %s668_s13 = smov 64   ;;  %s669_s14 = smov 4  }
  0x12   :  { %41 = dma.hbm_to_vmem [thread:$0]  %s813_s3, 1024, %s36_s25, [#allocation5], %s668_s13, %s668_s13, %s669_s14  }
  0x13   :  { %s618_s19 = scalar_lea.hbm %s811_s1, 1024 }
  0x14   :  { %p619_p8 = scmp.ne.s32.totalorder %s811_s1, %s618_s19  ;;  %p622_p9 = scmp.lt.u32.totalorder %s618_s19, %s811_s1 }
  0x16   :  { %p624_p10 = pnand %p622_p9, %p619_p8 }
  0x18   :  { %627 = shalt.err (!%p624_p10)
}
  0x19   :  { %s628_s24 = scalar_lea.vmem %s713_s27, 1024  ;;  %p633_p12 = scmp.lt.s32.totalorder %s713_s27, %s713_s27 }
  0x1a   :  { %p629_p11 = scmp.ne.s32.totalorder %s713_s27, %s628_s24  ;;  %p634_p13 = scmp.lt.s32.totalorder %s628_s24, %s628_s24 }
  0x1c   :  { %p635_p0 = por %p634_p13, %p633_p12 }
  0x1e   :  { %p636_p1 = pnand %p635_p0, %p629_p11 }
  0x20   :  { %639 = shalt.err (!%p636_p1)
}
  0x21   :  { %27 = dma.hbm_to_vmem [thread:$0]  %s811_s1, 1024, %s713_s27, [#allocation3], %s668_s13, %s668_s13, %s669_s14  }
  0x22   :  { %s670_s26 = smov [#allocation6]   ;;  %s640_s8 = scalar_lea.hbm %s815_s5, 1024 }
  0x23   :  { %s49_s28 = sshll.u32 %s670_s26, 4  ;;  %p641_p2 = scmp.ne.s32.totalorder %s815_s5, %s640_s8  ;;  %s50_s28 = int_to_ptr.vmem [resolvable:$true] %s49_s28 }
  0x24   :  { %p644_p3 = scmp.lt.u32.totalorder %s640_s8, %s815_s5 }
  0x26   :  { %p646_p4 = pnand %p644_p3, %p641_p2 }
  0x28   :  { %649 = shalt.err (!%p646_p4)
}
  0x29   :  { %s650_s15 = scalar_lea.vmem %s50_s28, 1024  ;;  %p655_p6 = scmp.lt.s32.totalorder %s50_s28, %s50_s28 }
  0x2a   :  { %p651_p5 = scmp.ne.s32.totalorder %s50_s28, %s650_s15  ;;  %p656_p7 = scmp.lt.s32.totalorder %s650_s15, %s650_s15 }
  0x2c   :  { %p657_p8 = por %p656_p7, %p655_p6 }
  0x2e   :  { %p658_p9 = pnand %p657_p8, %p651_p5 }
  0x30   :  { %661 = shalt.err (!%p658_p9)
}
  0x31   :  { %55 = dma.hbm_to_vmem [thread:$0]  %s815_s5, 1024, %s50_s28, [#allocation5], %s668_s13, %s668_s13, %s669_s14  }
  0x32   :  { %662 = dma.done.wait [#allocation3], 1024  }
  0x33   :  { %663 = vsyncadd [#allocation3], 4294966272 }
  0x34   :  { %664 = dma.done.wait [#allocation5], 2048  }
  0x35   :  { %665 = vsyncadd [#allocation5], 4294965248  ;;  %v671_v0 = vmov 0.0   ;;  %vm672_vm0 = vmmov 0   ;;  %v567_v1 = vld [vmem:[#allocation2] sm:$0xff]   ;;  %v568_v2 = vld [vmem:[#allocation2 + $0x8] sm:$0xff]  }
  0x36   :  { %500 = vmatprep.subr.bf16.mxu0 %v671_v0  ;;  %516 = vmatprep.mubr.msk.bf16.mxu0 %vm672_vm0, %v671_v0  ;;  %v569_v3 = vld [vmem:[#allocation2 + $0x10] sm:$0xff]   ;;  %v576_v4 = vld [vmem:[#allocation4] sm:$0xff]   ;;  %v570_v5 = vld [vmem:[#allocation2 + $0x18] sm:$0xff]  }
  0x37   :  { %520 = vmatprep.subr.bf16.mxu1 %v671_v0  ;;  %536 = vmatprep.mubr.msk.bf16.mxu1 %vm672_vm0, %v671_v0  ;;  %v577_v6 = vld [vmem:[#allocation4 + $0x8] sm:$0xff]   ;;  %v571_v7 = vld [vmem:[#allocation2 + $0x20] sm:$0xff]   ;;  %v578_v8 = vld [vmem:[#allocation4 + $0x10] sm:$0xff]  }
  0x38   :  { %501 = vmatpush3.bf16.msra.mxu0 %v567_v1  ;;  %521 = vmatpush3.bf16.msra.mxu1 %v576_v4  ;;  %v572_v9 = vld [vmem:[#allocation2 + $0x28] sm:$0xff]   ;;  %v579_v10 = vld [vmem:[#allocation4 + $0x18] sm:$0xff]   ;;  %v573_v11 = vld [vmem:[#allocation2 + $0x30] sm:$0xff]  }
  0x39   :  { %502 = vmatprep.subr.bf16.mxu0 %v671_v0  ;;  %522 = vmatprep.subr.bf16.mxu1 %v671_v0  ;;  %v580_v12 = vld [vmem:[#allocation4 + $0x20] sm:$0xff]   ;;  %v574_v13 = vld [vmem:[#allocation2 + $0x38] sm:$0xff]   ;;  %v581_v14 = vld [vmem:[#allocation4 + $0x28] sm:$0xff]  }
  0x3a   :  { %v575_v15 = vld [vmem:[%s810_s0] sm:$0xff]   ;;  %v582_v16 = vld [vmem:[#allocation4 + $0x30] sm:$0xff]   ;;  %v583_v17 = vld [vmem:[#allocation4 + $0x38] sm:$0xff]  }
  0x3b   :  { %v584_v18 = vld [vmem:[#allocation6] sm:$0xff]   ;;  %v585_v19 = vld [vmem:[#allocation6 + $0x8] sm:$0xff]   ;;  %v586_v20 = vld [vmem:[#allocation6 + $0x10] sm:$0xff]  }
  0x3c   :  { %503 = vmatpush3.bf16.msra.mxu0 %v568_v2  ;;  %523 = vmatpush3.bf16.msra.mxu1 %v577_v6  ;;  %v587_v21 = vld [vmem:[#allocation6 + $0x18] sm:$0xff]   ;;  %v588_v22 = vld [vmem:[#allocation6 + $0x20] sm:$0xff]   ;;  %v589_v23 = vld [vmem:[#allocation6 + $0x28] sm:$0xff]  }
  0x3d   :  { %504 = vmatprep.subr.bf16.mxu0 %v671_v0  ;;  %524 = vmatprep.subr.bf16.mxu1 %v671_v0  ;;  %v436_v24 = vld [vmem:[%s812_s2] ss:$0 sm:$0xff]  ;;  %v590_v34 = vld [vmem:[#allocation6 + $0x30] sm:$0xff]   ;;  %v591_v35 = vld [vmem:[#allocation6 + $0x38] sm:$0xff]  }
  0x3e   :  { %v446_v36 = vld [vmem:[%s814_s4] ss:$0 sm:$0xff] }
  0x3f   :  { %v455_v46 = vld [vmem:[%s816_s6] ss:$0 sm:$0xff] }
  0x40   :  { %505 = vmatpush3.bf16.msra.mxu0 %v569_v3  ;;  %525 = vmatpush3.bf16.msra.mxu1 %v578_v8 }
  0x41   :  { %506 = vmatprep.subr.bf16.mxu0 %v671_v0  ;;  %526 = vmatprep.subr.bf16.mxu1 %v671_v0 }
  0x44   :  { %507 = vmatpush3.bf16.msra.mxu0 %v570_v5  ;;  %527 = vmatpush3.bf16.msra.mxu1 %v579_v10 }
  0x45   :  { %508 = vmatprep.subr.bf16.mxu0 %v671_v0  ;;  %528 = vmatprep.subr.bf16.mxu1 %v671_v0 }
  0x48   :  { %509 = vmatpush3.bf16.msra.mxu0 %v571_v7  ;;  %529 = vmatpush3.bf16.msra.mxu1 %v580_v12 }
  0x49   :  { %510 = vmatprep.subr.bf16.mxu0 %v671_v0  ;;  %530 = vmatprep.subr.bf16.mxu1 %v671_v0 }
  0x4c   :  { %511 = vmatpush3.bf16.msra.mxu0 %v572_v9  ;;  %531 = vmatpush3.bf16.msra.mxu1 %v581_v14 }
  0x4d   :  { %512 = vmatprep.subr.bf16.mxu0 %v671_v0  ;;  %532 = vmatprep.subr.bf16.mxu1 %v671_v0 }
  0x50   :  { %513 = vmatpush3.bf16.msra.mxu0 %v573_v11  ;;  %533 = vmatpush3.bf16.msra.mxu1 %v582_v16 }
  0x51   :  { %514 = vmatprep.subr.bf16.mxu0 %v671_v0  ;;  %534 = vmatprep.subr.bf16.mxu1 %v671_v0 }
  0x54   :  { %515 = vmatpush3.bf16.msra.mxu0 %v574_v13  ;;  %535 = vmatpush3.bf16.msra.mxu1 %v583_v17 }
  0x55   :  { %540 = vmatprep.subr.bf16.mxu0 %v671_v0 }
  0x57   :  { %517 = vmatmul.mubr.bf16.vlgmr.msra.gmra.mrb[0].mxu0 %v575_v15 }
  0x58   :  { %556 = vmatprep.mubr.msk.bf16.mxu0 %vm672_vm0, %v671_v0  ;;  %541 = vmatpush3.bf16.msra.mxu0 %v584_v18 }
  0x59   :  { %542 = vmatprep.subr.bf16.mxu0 %v671_v0 }
  0x5c   :  { %543 = vmatpush3.bf16.msra.mxu0 %v585_v19 }
  0x5d   :  { %544 = vmatprep.subr.bf16.mxu0 %v671_v0 }
  0x60   :  { %545 = vmatpush3.bf16.msra.mxu0 %v586_v20 }
  0x61   :  { %546 = vmatprep.subr.bf16.mxu0 %v671_v0 }
  0x64   :  { %547 = vmatpush3.bf16.msra.mxu0 %v587_v21 }
  0x65   :  { %548 = vmatprep.subr.bf16.mxu0 %v671_v0 }
  0x68   :  { %549 = vmatpush3.bf16.msra.mxu0 %v588_v22 }
  0x69   :  { %550 = vmatprep.subr.bf16.mxu0 %v671_v0 }
  0x6c   :  { %551 = vmatpush3.bf16.msra.mxu0 %v589_v23 }
  0x6d   :  { %552 = vmatprep.subr.bf16.mxu0 %v671_v0 }
  0x70   :  { %553 = vmatpush3.bf16.msra.mxu0 %v590_v34 }
  0x71   :  { %554 = vmatprep.subr.bf16.mxu0 %v671_v0 }
  0x74   :  { %555 = vmatpush3.bf16.msra.mxu0 %v591_v35 }
 0x12a   :  { %v181_v25 = vpop.f32.mrb[0].mxu0 }
 0x12b   :  { %v182_v26 = vadd.f32 %v436_v24, %v181_v25  ;;  %v518_v27 = vpop.f32.mrb[1].mxu0 }
 0x12c   :  { %v184_v28 = vpop.f32.mrb[2].mxu0 }
 0x12d   :  { %v185_v29 = vadd.f32 %v436_v24, %v184_v28  ;;  %v519_v30 = vpop.f32.mrb[3].mxu0  ;;  %v188_v31 = vmax.f32 %v182_v26, 0.0 }
 0x12f   :  { %v189_v32 = vmax.f32 %v185_v29, 0.0 }
 0x131   :  { %v190_v33 = vpack.c.bf16 %v189_v32, %v188_v31 }
 0x133   :  { %537 = vmatmul.mubr.bf16.vlgmr.msra.gmra.mrb[0].mxu1 %v190_v33 }
 0x206   :  { %v296_v37 = vpop.f32.mrb[0].mxu1 }
 0x207   :  { %v297_v38 = vadd.f32 %v446_v36, %v296_v37  ;;  %v538_v39 = vpop.f32.mrb[1].mxu1 }
 0x208   :  { %v299_v40 = vpop.f32.mrb[2].mxu1 }
 0x209   :  { %v300_v41 = vadd.f32 %v446_v36, %v299_v40  ;;  %v539_v42 = vpop.f32.mrb[3].mxu1  ;;  %v303_v43 = vmax.f32 %v297_v38, 0.0 }
 0x20b   :  { %v304_v44 = vmax.f32 %v300_v41, 0.0 }
 0x20d   :  { %v305_v45 = vpack.c.bf16 %v304_v44, %v303_v43 }
 0x20f   :  { %557 = vmatmul.mubr.bf16.vlgmr.msra.gmra.mrb[4].mxu0 %v305_v45 }
 0x2e2   :  { %v411_v47 = vpop.f32.mrb[4].mxu0 }
 0x2e3   :  { %v412_v48 = vadd.f32 %v455_v46, %v411_v47  ;;  %v558_v49 = vpop.f32.mrb[5].mxu0 }
 0x2e4   :  { %v414_v50 = vpop.f32.mrb[6].mxu0 }
 0x2e5   :  { %v415_v51 = vadd.f32 %v455_v46, %v414_v50  ;;  %v559_v52 = vpop.f32.mrb[7].mxu0  ;;  %592 = vtanh.f32 %v412_v48 }
 0x2e7   :  { %594 = vtanh.f32 %v415_v51 }
 0x2ef   :  { %v593_v53 = vpop.eup %592 }
 0x2f1   :  { %v595_v54 = vpop.eup %594 }
 0x2f2   :  { %v471_v55 = vpack.c.bf16 %v595_v54, %v593_v53 }
 0x2f4   :  { %472 = vst [vmem:[%s817_s7] sm:$0xff] %v471_v55  }
 0x2f5   :  { %434 = vsyncpa [#allocation3], 1 }
 0x2f6   :  { %435 = vsyncpa [#allocation5], 1 }

</bundles_post_ra>
